<compile_context>
chip_gen: v6e
topology: v6e:2x2x1
jax: 0.10.0
libtpu: 0.0.40
codegen_flags: <defaults>
</compile_context>

<pallas_src>
import jax
import jax.numpy as jnp
from jax.experimental import pallas as pl
from jax.experimental.pallas import tpu as pltpu


def build_sincos_table(context_size: int, embed_size: int) -> jnp.ndarray:
    """Deterministic sin/cos table, identical math to get_sin_cos_embeddings."""
    assert embed_size % 2 == 0, "embed_size assumed even (matches module usage)"
    pos = jnp.arange(context_size, dtype=jnp.float32)             # (C,)
    i = jnp.arange(embed_size // 2, dtype=jnp.float32)            # (E/2,)
    denom = jnp.power(10000.0, (2.0 * i) / float(embed_size))     # (E/2,)
    ang = pos[:, None] / denom[None, :]                           # (C, E/2)
    emb = jnp.zeros((context_size, embed_size), dtype=jnp.float32)
    emb = emb.at[:, 0::2].set(jnp.sin(ang))
    emb = emb.at[:, 1::2].set(jnp.cos(ang))
    return emb


def _split_table_bf16x3(table_f32: jnp.ndarray) -> jnp.ndarray:
    """Split an f32 table into 3 bf16 slabs (t0+t1+t2 reconstructs it <=1 ulp),
    stacked along rows as a single (3C, E) matrix for one K=3C matmul."""
    t0 = table_f32.astype(jnp.bfloat16)
    r1 = table_f32 - t0.astype(jnp.float32)
    t1 = r1.astype(jnp.bfloat16)
    r2 = r1 - t1.astype(jnp.float32)
    t2 = r2.astype(jnp.bfloat16)
    return jnp.concatenate([t0, t1, t2], axis=0)                  # (3C, E) bf16


def _gather_kernel(idx_ref, tab_ref, out_ref):
    # idx_ref : (TM, 1)  int32, VMEM  -- token indices for this tile
    # tab_ref : (3C, E)  bf16,  VMEM  -- resident slab-stacked table [t0; t1; t2]
    # out_ref : (TM, E)  f32,   VMEM  -- gathered rows
    tm = out_ref.shape[0]
    c = tab_ref.shape[0] // 3
    # Clamp guards (a) out-of-range tokens and (b) garbage rows of a partial
    # trailing index block.
    # TODO(synk): PyTorch nn.Embedding raises on out-of-range indices; we clamp.
    idx = jnp.clip(idx_ref[...], 0, c - 1)                        # (TM, 1)
    iota = jax.lax.broadcasted_iota(jnp.int32, (tm, c), 1)        # (TM, C)
    onehot_c = (idx == iota).astype(jnp.bfloat16)                 # (TM, C)
    # Fused K=3C one-hot: three ones per row (one per slab), so the MXU
    # accumulates t0[idx]+t1[idx]+t2[idx] in f32 internally in ONE matmul.
    onehot = jnp.tile(onehot_c, (1, 3))                           # (TM, 3C)
    out_ref[...] = jnp.dot(
        onehot, tab_ref[...], preferred_element_type=jnp.float32
    ).astype(out_ref.dtype)


def sincos_position_encoding(t: jnp.ndarray, table: jnp.ndarray,
                             *, tile_tokens: int = 2048) -> jnp.ndarray:
    """Pallas embedding-lookup: returns table[t] with shape t.shape + (E,)."""
    C, E = table.shape
    orig_shape = t.shape
    idx = t.reshape(-1).astype(jnp.int32)                         # (N,)
    N = idx.shape[0]

    # Token tile: multiple of 8 sublanes, capped at tile_tokens (>=1024 default
    # per review; raise further on v7x if profiling shows step-overhead bound).
    tm = min(tile_tokens, max(8, ((N + 7) // 8) * 8))
    n_tiles = pl.cdiv(N, tm)

    idx2 = idx.reshape(N, 1)                                      # no padding
    parts = _split_table_bf16x3(table)                            # (3C, E) bf16

    # VMEM budget (bytes): table (assume worst-case double buffer) + output
    # double buffer + index tiles ((TM,1) int32 pads to 128 lanes in VMEM).
    table_bytes = 3 * C * E * 2
    out_bytes = 2 * tm * E * 4
    idx_bytes = 2 * tm * 128 * 4
    vmem_need = 2 * table_bytes + out_bytes + idx_bytes + (2 << 20)
    vmem_limit = int(min(max(vmem_need, 32 << 20), 128 << 20))

    compiler_params = pltpu.CompilerParams(
        dimension_semantics=("parallel",),          # token tiles are independent
        vmem_limit_bytes=vmem_limit,                # v5e scoped default is 16 MiB
    )
    cost = pl.CostEstimate(
        flops=2 * n_tiles * tm * (3 * C) * E,
        transcendentals=0,
        bytes_accessed=N * E * 4 + 3 * C * E * 2 + N * 4,
    )
    out_shape = jax.ShapeDtypeStruct((N, E), jnp.float32)
    idx_spec = pl.BlockSpec((tm, 1), lambda i: (i, 0))
    out_spec = pl.BlockSpec((tm, E), lambda i: (i, 0))

    def run(single_buffer_table: bool):
        if single_buffer_table:
            # Constant index_map -> double-buffering the table buys nothing;
            # single-buffer halves its footprint (matters on v7x's 64 MiB VMEM).
            tab_spec = pl.BlockSpec((3 * C, E), lambda i: (0, 0),
                                    pipeline_mode=pl.Buffered(1))
        else:
            tab_spec = pl.BlockSpec((3 * C, E), lambda i: (0, 0))
        return pl.pallas_call(
            _gather_kernel,
            out_shape=out_shape,
            grid=(n_tiles,),
            in_specs=[idx_spec, tab_spec],
            out_specs=out_spec,
            compiler_params=compiler_params,
            cost_estimate=cost,
        )(idx2, parts)

    try:
        out = run(True)
    except Exception:  # fall back if this jax build rejects pipeline_mode=Buffered(1)
        out = run(False)

    return out.reshape(*orig_shape, E)


if __name__ == "__main__":
    # Small, module-consistent shapes.
    context_size = 64
    embed_size = 128
    batch, seq = 2, 8

    # Deterministic "parameters" (the frozen embedding table).
    table = build_sincos_table(context_size, embed_size)

    # Deterministic example token-position indices.
    key = jax.random.PRNGKey(0)
    t = jax.random.randint(key, (batch, seq), 0, context_size, dtype=jnp.int32)

    out = sincos_position_encoding(t, table)
    out = jax.block_until_ready(out)

    # Sanity check against the pure-JAX reference (table[t]).
    ref = jnp.take(table, t.reshape(-1), axis=0).reshape(batch, seq, embed_size)
    assert out.shape == (batch, seq, embed_size)
    assert out.dtype == jnp.float32
    assert bool(jnp.allclose(out, ref, atol=1e-6, rtol=1e-6))

    print("KERNEL_OK")
</pallas_src>

<mosaic_0001>
module attributes {stable_mosaic.version = 11 : i64} {
  func.func @_gather_kernel(%arg0: i32, %arg1: memref<16x1xi32, #tpu.memory_space<vmem>>, %arg2: memref<192x128xbf16, #tpu.memory_space<vmem>>, %arg3: memref<16x128xf32, #tpu.memory_space<vmem>>) attributes {dimension_semantics = [#tpu.dimension_semantics<parallel>], iteration_bounds = array<i64: 1>, scalar_prefetch = 0 : i64, scratch_operands = 0 : i64, tpu.core_type = #tpu.core_type<tc>, window_params = [{transform_indices = @transform_0, window_bounds = array<i64: 16, 1>}, {pipeline_mode = #tpu.pipeline_mode<synchronous>, transform_indices = @transform_1, window_bounds = array<i64: 192, 128>}, {transform_indices = @transform_2, window_bounds = array<i64: 16, 128>}]} {
    %c0 = arith.constant 0 : index
    %c0_0 = arith.constant 0 : index
    %0 = vector.load %arg1[%c0, %c0_0] : memref<16x1xi32, #tpu.memory_space<vmem>>, vector<16x1xi32>
    %c0_i32 = arith.constant 0 : i32
    %c63_i32 = arith.constant 63 : i32
    %1 = vector.broadcast %c0_i32 : i32 to vector<16x1xi32>
    %2 = arith.maxsi %1, %0 : vector<16x1xi32>
    %3 = vector.broadcast %c63_i32 : i32 to vector<16x1xi32>
    %4 = arith.minsi %3, %2 : vector<16x1xi32>
    %5 = tpu.iota {dimensions = array<i32: 1>} : vector<16x64xi32>
    %6 = vector.broadcast %4 : vector<16x1xi32> to vector<16x64xi32>
    %7 = arith.cmpi eq, %6, %5 : vector<16x64xi32>
    %8 = arith.extui %7 : vector<16x64xi1> to vector<16x64xi32>
    %9 = arith.sitofp %8 : vector<16x64xi32> to vector<16x64xf32>
    %10 = arith.truncf %9 : vector<16x64xf32> to vector<16x64xbf16>
    %11 = tpu.concatenate %10, %10, %10 in 1 : vector<16x64xbf16>, vector<16x64xbf16>, vector<16x64xbf16> -> vector<16x192xbf16>
    %c0_1 = arith.constant 0 : index
    %c0_2 = arith.constant 0 : index
    %12 = vector.load %arg2[%c0_1, %c0_2] : memref<192x128xbf16, #tpu.memory_space<vmem>>, vector<192x128xbf16>
    %cst = arith.constant dense<0.000000e+00> : vector<16x128xf32>
    %13 = tpu.matmul %11, %12, %cst {dimension_numbers = #tpu.dot_dimension_numbers<[1], [0], [0], [1], [0, 0, 1, 1], [], []>} : vector<16x192xbf16>, vector<192x128xbf16>, vector<16x128xf32> -> vector<16x128xf32>
    %c0_3 = arith.constant 0 : index
    %c0_4 = arith.constant 0 : index
    %14 = vector.load %arg3[%c0_3, %c0_4] : memref<16x128xf32, #tpu.memory_space<vmem>>, vector<16x128xf32>
    tpu.vector_store %arg3[%c0_3, %c0_4], %13 {strides = array<i32>} : memref<16x128xf32, #tpu.memory_space<vmem>>, vector<16x128xf32>,
    return
  }
  func.func @transform_0(%arg0: i32) -> (i32, i32) {
    %c0_i32 = arith.constant 0 : i32
    %c0_i32_0 = arith.constant 0 : i32
    return %arg0, %c0_i32 : i32, i32
  }
  func.func @transform_1(%arg0: i32) -> (i32, i32) {
    %c0_i32 = arith.constant 0 : i32
    %c0_i32_0 = arith.constant 0 : i32
    %c0_i32_1 = arith.constant 0 : i32
    return %c0_i32, %c0_i32_0 : i32, i32
  }
  func.func @transform_2(%arg0: i32) -> (i32, i32) {
    %c0_i32 = arith.constant 0 : i32
    %c0_i32_0 = arith.constant 0 : i32
    return %arg0, %c0_i32 : i32, i32
  }
}

module attributes {stable_mosaic.version = 11 : i64} {
  func.func @_gather_kernel(%arg0: i32, %arg1: memref<16x1xi32, #tpu.memory_space<vmem>>, %arg2: memref<192x128xbf16, #tpu.memory_space<vmem>>, %arg3: memref<16x128xf32, #tpu.memory_space<vmem>>) attributes {dimension_semantics = [#tpu.dimension_semantics<parallel>], iteration_bounds = array<i64: 1>, scalar_prefetch = 0 : i64, scratch_operands = 0 : i64, tpu.core_type = #tpu.core_type<tc>, window_params = [{transform_indices = @transform_0, window_bounds = array<i64: 16, 1>}, {pipeline_mode = #tpu.pipeline_mode<synchronous>, transform_indices = @transform_1, window_bounds = array<i64: 192, 128>}, {transform_indices = @transform_2, window_bounds = array<i64: 16, 128>}]} {
    %c0 = arith.constant 0 : index
    %c0_0 = arith.constant 0 : index
    %0 = vector.load %arg1[%c0, %c0_0] : memref<16x1xi32, #tpu.memory_space<vmem>>, vector<16x1xi32>
    %c0_i32 = arith.constant 0 : i32
    %c63_i32 = arith.constant 63 : i32
    %1 = vector.broadcast %c0_i32 : i32 to vector<16x1xi32>
    %2 = arith.maxsi %1, %0 : vector<16x1xi32>
    %3 = vector.broadcast %c63_i32 : i32 to vector<16x1xi32>
    %4 = arith.minsi %3, %2 : vector<16x1xi32>
    %5 = tpu.iota {dimensions = array<i32: 1>} : vector<16x64xi32>
    %6 = vector.broadcast %4 : vector<16x1xi32> to vector<16x64xi32>
    %7 = arith.cmpi eq, %6, %5 : vector<16x64xi32>
    %8 = arith.extui %7 : vector<16x64xi1> to vector<16x64xi32>
    %9 = arith.sitofp %8 : vector<16x64xi32> to vector<16x64xf32>
    %10 = arith.truncf %9 : vector<16x64xf32> to vector<16x64xbf16>
    %11 = tpu.concatenate %10, %10, %10 in 1 : vector<16x64xbf16>, vector<16x64xbf16>, vector<16x64xbf16> -> vector<16x192xbf16>
    %c0_1 = arith.constant 0 : index
    %c0_2 = arith.constant 0 : index
    %12 = vector.load %arg2[%c0_1, %c0_2] : memref<192x128xbf16, #tpu.memory_space<vmem>>, vector<192x128xbf16>
    %cst = arith.constant dense<0.000000e+00> : vector<16x128xf32>
    %13 = tpu.matmul %11, %12, %cst {dimension_numbers = #tpu.dot_dimension_numbers<[1], [0], [0], [1], [0, 0, 1, 1], [], []>} : vector<16x192xbf16>, vector<192x128xbf16>, vector<16x128xf32> -> vector<16x128xf32>
    %c0_3 = arith.constant 0 : index
    %c0_4 = arith.constant 0 : index
    %14 = vector.load %arg3[%c0_3, %c0_4] : memref<16x128xf32, #tpu.memory_space<vmem>>, vector<16x128xf32>
    tpu.vector_store %arg3[%c0_3, %c0_4], %13 {strides = array<i32>} : memref<16x128xf32, #tpu.memory_space<vmem>>, vector<16x128xf32>,
    return
  }
  func.func @transform_0(%arg0: i32) -> (i32, i32) {
    %c0_i32 = arith.constant 0 : i32
    %c0_i32_0 = arith.constant 0 : i32
    return %arg0, %c0_i32 : i32, i32
  }
  func.func @transform_1(%arg0: i32) -> (i32, i32) {
    %c0_i32 = arith.constant 0 : i32
    %c0_i32_0 = arith.constant 0 : i32
    %c0_i32_1 = arith.constant 0 : i32
    return %c0_i32, %c0_i32_0 : i32, i32
  }
  func.func @transform_2(%arg0: i32) -> (i32, i32) {
    %c0_i32 = arith.constant 0 : i32
    %c0_i32_0 = arith.constant 0 : i32
    return %arg0, %c0_i32 : i32, i32
  }
}

</mosaic_0001>

<bundles_post_ra>
// kernel: tpu_custom_call.1
= control target key start
LH: loop header
LB: loop body
LE: loop exit
PB: predicated region body
PF: predicated region fallthrough
CT: control target
= control target key end

     0   :  { %7 = vsyncpa [#allocation3], 0  ;;  %s336_s0 = inlined_call_operand.vmem [shape: s32[16,1], index: 0, kind: input, shape index: {}]   ;;  %s337_s1 = inlined_call_operand.hbm [shape: bf16[192,128], index: 1, kind: input, shape index: {}]   ;;  %s338_s2 = inlined_call_operand.hbm [shape: f32[16,128], index: 2, kind: output, shape index: {}]  }
   0x1   :  { %8 = vsyncpa [#allocation4], 0  ;;  %s298_s9 = smov [#allocation2]  }
   0x2   :  { %s16_s10 = sshll.u32 %s298_s9, 4  ;;  %s17_s10 = int_to_ptr.vmem [resolvable:$true] %s16_s10 }
   0x3   :  { %s262_s11 = scalar_lea.vmem %s17_s10, 1536  ;;  %p267_p1 = scmp.lt.s32.totalorder %s17_s10, %s17_s10 }
   0x4   :  { %p263_p0 = scmp.ne.s32.totalorder %s17_s10, %s262_s11  ;;  %p268_p2 = scmp.lt.s32.totalorder %s262_s11, %s262_s11 }
   0x6   :  { %p269_p3 = por %p268_p2, %p267_p1 }
   0x8   :  { %p270_p4 = pnand %p269_p3, %p263_p0 }
   0xa   :  { %273 = shalt.err (!%p270_p4)
}
   0xb   :  { %s299_s12 = smov 64   ;;  %s300_s13 = smov 4  }
   0xc   :  { %22 = dma.hbm_to_vmem [thread:$0]  %s337_s1, 1536, %s17_s10, [#allocation3], %s299_s12, %s299_s12, %s300_s13  }
   0xd   :  { %294 = dma.done.wait [#allocation3], 1536  }
   0xe   :  { %295 = vsyncadd [#allocation3], 4294965760  ;;  %v301_v0 = vmov 0   ;;  %v27_v1 = vld [vmem:[%s336_s0] sm:$0xff]  ;;  %v28_v2 = vld [vmem:[%s336_s0 + $0x8] sm:$0xff]  ;;  %v37_v19 = vlaneseq  ;;  %v302_v23 = vmov 0.0  }
   0xf   :  { %241 = vset.pattern.permute.xlu0 %v301_v0  ;;  %158 = vmatprep.subr.bf16.mxu0 %v301_v0  ;;  %vm29_vm0 = vcmp.gt.s32.totalorder %v27_v1, 0  ;;  %vm31_vm1 = vcmp.gt.s32.totalorder %v28_v2, 0  ;;  %v242_v7 = vld [vmem:[#allocation2 + $0x38] sm:$0xff]   ;;  %v243_v8 = vld [vmem:[#allocation2 + $0x30] sm:$0xff]   ;;  %v244_v9 = vld [vmem:[#allocation2 + $0x28] sm:$0xff]   ;;  %vm55_vm6 = vcmask 523264  }
  0x10   :  { %v30_v3 = vsel %vm29_vm0, %v27_v1, 0  ;;  %v32_v4 = vsel %vm31_vm1, %v28_v2, 0  ;;  %159 = vmatpush1.bf16.msra.mxu0 %v242_v7  ;;  %v245_v10 = vld [vmem:[#allocation2 + $0x20] sm:$0xff]   ;;  %v246_v11 = vld [vmem:[#allocation2 + $0x18] sm:$0xff]   ;;  %v247_v12 = vld [vmem:[#allocation2 + $0x10] sm:$0xff]   ;;  %v38_v20 = vand.u32 127, %v37_v19 }
  0x11   :  { %vm33_vm2 = vcmp.lt.s32.totalorder %v30_v3, 63  ;;  %vm35_vm3 = vcmp.lt.s32.totalorder %v32_v4, 63  ;;  %160 = vmatprep.subr.bf16.mxu0 %v301_v0  ;;  %v248_v13 = vld [vmem:[#allocation2 + $0x8] sm:$0xff]   ;;  %v249_v14 = vld [vmem:[#allocation2] sm:$0xff]   ;;  %v250_v15 = vld [vmem:[#allocation2 + $0x58] sm:$0xff]   ;;  %s303_s0 = smov [#allocation5]  }
  0x12   :  { %v34_v5 = vsel %vm33_vm2, %v30_v3, 63  ;;  %v36_v6 = vsel %vm35_vm3, %v32_v4, 63  ;;  %v251_v16 = vld [vmem:[#allocation2 + $0x50] sm:$0xff]   ;;  %v252_v17 = vld [vmem:[#allocation2 + $0x48] sm:$0xff]   ;;  %v253_v18 = vld [vmem:[#allocation2 + $0x40] sm:$0xff]   ;;  %s206_s1 = sshll.u32 %s303_s0, 4  ;;  %s207_s1 = int_to_ptr.vmem [resolvable:$true] %s206_s1 }
  0x13   :  { %40 = vperm.xlu0 %241, %v34_v5   ;;  %s274_s20 = scalar_lea.vmem %s207_s1, 256  ;;  %p279_p6 = scmp.lt.s32.totalorder %s207_s1, %s207_s1 }
  0x14   :  { %161 = vmatpush1.bf16.msra.mxu0 %v243_v8  ;;  %p275_p5 = scmp.ne.s32.totalorder %s207_s1, %s274_s20  ;;  %p280_p7 = scmp.lt.s32.totalorder %s274_s20, %s274_s20 }
  0x15   :  { %162 = vmatprep.subr.bf16.mxu0 %v301_v0 }
  0x16   :  { %p281_p8 = por %p280_p7, %p279_p6 }
  0x17   :  { %43 = vperm.xlu0 %241, %v36_v6  }
  0x18   :  { %163 = vmatpush1.bf16.msra.mxu0 %v244_v9  ;;  %p282_p9 = pnand %p281_p8, %p275_p5 }
  0x19   :  { %164 = vmatprep.subr.bf16.mxu0 %v301_v0 }
  0x1c   :  { %165 = vmatpush1.bf16.msra.mxu0 %v245_v10 }
  0x1d   :  { %166 = vmatprep.subr.bf16.mxu0 %v301_v0 }
  0x20   :  { %167 = vmatpush1.bf16.msra.mxu0 %v246_v11 }
  0x21   :  { %168 = vmatprep.subr.bf16.mxu0 %v301_v0 }
  0x24   :  { %169 = vmatpush1.bf16.msra.mxu0 %v247_v12 }
  0x25   :  { %170 = vmatprep.subr.bf16.mxu0 %v301_v0 }
  0x28   :  { %171 = vmatpush1.bf16.msra.mxu0 %v248_v13 }
  0x29   :  { %172 = vmatprep.subr.bf16.mxu0 %v301_v0 }
  0x2c   :  { %173 = vmatpush1.bf16.msra.mxu0 %v249_v14 }
  0x2d   :  { %182 = vmatprep.subr.bf16.mxu0 %v301_v0 }
  0x30   :  { %183 = vmatpush2.bf16.msra.mxu0 %v250_v15 }
  0x31   :  { %184 = vmatprep.subr.bf16.mxu0 %v301_v0 }
  0x34   :  { %185 = vmatpush2.bf16.msra.mxu0 %v251_v16 }
  0x35   :  { %186 = vmatprep.subr.bf16.mxu0 %v301_v0 }
  0x38   :  { %187 = vmatpush2.bf16.msra.mxu0 %v252_v17 }
  0x39   :  { %188 = vmatprep.subr.bf16.mxu0 %v301_v0 }
  0x3c   :  { %189 = vmatpush2.bf16.msra.mxu0 %v253_v18 }
  0x8e   :  { %v41_v21 = vpop.permute.xlu0 %40 }
  0x8f   :  { %vm45_vm4 = vcmp.eq.s32.totalorder %v41_v21, %v38_v20 }
  0x90   :  { %v218_v24 = vsel %vm45_vm4, 1.0, %v302_v23 }
  0x92   :  { %v44_v22 = vpop.permute.xlu0 %43 }
  0x93   :  { %vm46_vm5 = vcmp.eq.s32.totalorder %v44_v22, %v38_v20 }
  0x94   :  { %v219_v25 = vsel %vm46_vm5, 1.0, %v302_v23 }
  0x95   :  { %v51_v26 = vpack.c.bf16 %v219_v25, %v218_v24 }
  0x97   :  { %53 = vrot.lane.b32.xlu1 %v51_v26, %s299_s12  ;;  %232 = vmatprep.mubr.msk.bf16.mxu0 %vm55_vm6, %v51_v26 }
 0x109   :  { %v54_v27 = vpop.permute.xlu1 %53 }
 0x10a   :  { %v58_v28 = vsel %vm55_vm6, %v51_v26, %v54_v27 }
 0x10b   :  { %191 = vmatmul.mubr.bf16.vlgmr.msra.gmra.mxu0 %v58_v28 }
 0x1cb   :  { %v192_v29 = vpop.f32.mrf.mxu0 }
 0x1cc   :  { %199 = vst [vmem:[#allocation5] sm:$0xff] %v192_v29 }
 0x1cd   :  { %v194_v30 = vpop.f32.mrf.mxu0 }
 0x1cf   :  { %v195_v31 = vpop.f32.mrf.mxu0 }
 0x1d0   :  { %200 = vst [vmem:[#allocation5 + $0x8] sm:$0xff] %v195_v31 }
 0x1d1   :  { %v197_v32 = vpop.f32.mrf.mxu0 }
 0x1d2   :  { %285 = shalt.err (!%p282_p9)
}
 0x1d3   :  { %s304_s21 = smov 128   ;;  %s305_s22 = smov 8  }
 0x1d4   :  { %212 = dma.vmem_to_hbm [thread:$0]  %s207_s1, 256, %s338_s2, [#allocation4], %s304_s21, %s304_s21, %s305_s22  }
 0x1d5   :  { %296 = dma.done.wait [#allocation4], 256  }
 0x1d6   :  { %297 = vsyncadd [#allocation4], 4294967040 }
 0x1d7   :  { %216 = vsyncpa [#allocation3], 1 }
 0x1d8   :  { %217 = vsyncpa [#allocation4], 1 }

// kernel: tpu_custom_call.1
= control target key start
LH: loop header
LB: loop body
LE: loop exit
PB: predicated region body
PF: predicated region fallthrough
CT: control target
= control target key end

     0   :  { %7 = vsyncpa [#allocation3], 0  ;;  %s336_s0 = inlined_call_operand.vmem [shape: s32[16,1], index: 0, kind: input, shape index: {}]   ;;  %s337_s1 = inlined_call_operand.hbm [shape: bf16[192,128], index: 1, kind: input, shape index: {}]   ;;  %s338_s2 = inlined_call_operand.hbm [shape: f32[16,128], index: 2, kind: output, shape index: {}]  }
   0x1   :  { %8 = vsyncpa [#allocation4], 0  ;;  %s298_s9 = smov [#allocation2]  }
   0x2   :  { %s16_s10 = sshll.u32 %s298_s9, 4  ;;  %s17_s10 = int_to_ptr.vmem [resolvable:$true] %s16_s10 }
   0x3   :  { %s262_s11 = scalar_lea.vmem %s17_s10, 1536  ;;  %p267_p1 = scmp.lt.s32.totalorder %s17_s10, %s17_s10 }
   0x4   :  { %p263_p0 = scmp.ne.s32.totalorder %s17_s10, %s262_s11  ;;  %p268_p2 = scmp.lt.s32.totalorder %s262_s11, %s262_s11 }
   0x6   :  { %p269_p3 = por %p268_p2, %p267_p1 }
   0x8   :  { %p270_p4 = pnand %p269_p3, %p263_p0 }
   0xa   :  { %273 = shalt.err (!%p270_p4)
}
   0xb   :  { %s299_s12 = smov 64   ;;  %s300_s13 = smov 4  }
   0xc   :  { %22 = dma.hbm_to_vmem [thread:$0]  %s337_s1, 1536, %s17_s10, [#allocation3], %s299_s12, %s299_s12, %s300_s13  }
   0xd   :  { %294 = dma.done.wait [#allocation3], 1536  }
   0xe   :  { %295 = vsyncadd [#allocation3], 4294965760  ;;  %v301_v0 = vmov 0   ;;  %v27_v1 = vld [vmem:[%s336_s0] sm:$0xff]  ;;  %v28_v2 = vld [vmem:[%s336_s0 + $0x8] sm:$0xff]  ;;  %v37_v19 = vlaneseq  ;;  %v302_v23 = vmov 0.0  }
   0xf   :  { %241 = vset.pattern.permute.xlu0 %v301_v0  ;;  %158 = vmatprep.subr.bf16.mxu0 %v301_v0  ;;  %vm29_vm0 = vcmp.gt.s32.totalorder %v27_v1, 0  ;;  %vm31_vm1 = vcmp.gt.s32.totalorder %v28_v2, 0  ;;  %v242_v7 = vld [vmem:[#allocation2 + $0x38] sm:$0xff]   ;;  %v243_v8 = vld [vmem:[#allocation2 + $0x30] sm:$0xff]   ;;  %v244_v9 = vld [vmem:[#allocation2 + $0x28] sm:$0xff]   ;;  %vm55_vm6 = vcmask 523264  }
  0x10   :  { %v30_v3 = vsel %vm29_vm0, %v27_v1, 0  ;;  %v32_v4 = vsel %vm31_vm1, %v28_v2, 0  ;;  %159 = vmatpush1.bf16.msra.mxu0 %v242_v7  ;;  %v245_v10 = vld [vmem:[#allocation2 + $0x20] sm:$0xff]   ;;  %v246_v11 = vld [vmem:[#allocation2 + $0x18] sm:$0xff]   ;;  %v247_v12 = vld [vmem:[#allocation2 + $0x10] sm:$0xff]   ;;  %v38_v20 = vand.u32 127, %v37_v19 }
  0x11   :  { %vm33_vm2 = vcmp.lt.s32.totalorder %v30_v3, 63  ;;  %vm35_vm3 = vcmp.lt.s32.totalorder %v32_v4, 63  ;;  %160 = vmatprep.subr.bf16.mxu0 %v301_v0  ;;  %v248_v13 = vld [vmem:[#allocation2 + $0x8] sm:$0xff]   ;;  %v249_v14 = vld [vmem:[#allocation2] sm:$0xff]   ;;  %v250_v15 = vld [vmem:[#allocation2 + $0x58] sm:$0xff]   ;;  %s303_s0 = smov [#allocation5]  }
  0x12   :  { %v34_v5 = vsel %vm33_vm2, %v30_v3, 63  ;;  %v36_v6 = vsel %vm35_vm3, %v32_v4, 63  ;;  %v251_v16 = vld [vmem:[#allocation2 + $0x50] sm:$0xff]   ;;  %v252_v17 = vld [vmem:[#allocation2 + $0x48] sm:$0xff]   ;;  %v253_v18 = vld [vmem:[#allocation2 + $0x40] sm:$0xff]   ;;  %s206_s1 = sshll.u32 %s303_s0, 4  ;;  %s207_s1 = int_to_ptr.vmem [resolvable:$true] %s206_s1 }
  0x13   :  { %40 = vperm.xlu0 %241, %v34_v5   ;;  %s274_s20 = scalar_lea.vmem %s207_s1, 256  ;;  %p279_p6 = scmp.lt.s32.totalorder %s207_s1, %s207_s1 }
  0x14   :  { %161 = vmatpush1.bf16.msra.mxu0 %v243_v8  ;;  %p275_p5 = scmp.ne.s32.totalorder %s207_s1, %s274_s20  ;;  %p280_p7 = scmp.lt.s32.totalorder %s274_s20, %s274_s20 }
  0x15   :  { %162 = vmatprep.subr.bf16.mxu0 %v301_v0 }
  0x16   :  { %p281_p8 = por %p280_p7, %p279_p6 }
  0x17   :  { %43 = vperm.xlu0 %241, %v36_v6  }
  0x18   :  { %163 = vmatpush1.bf16.msra.mxu0 %v244_v9  ;;  %p282_p9 = pnand %p281_p8, %p275_p5 }
  0x19   :  { %164 = vmatprep.subr.bf16.mxu0 %v301_v0 }
  0x1c   :  { %165 = vmatpush1.bf16.msra.mxu0 %v245_v10 }
  0x1d   :  { %166 = vmatprep.subr.bf16.mxu0 %v301_v0 }
  0x20   :  { %167 = vmatpush1.bf16.msra.mxu0 %v246_v11 }
  0x21   :  { %168 = vmatprep.subr.bf16.mxu0 %v301_v0 }
  0x24   :  { %169 = vmatpush1.bf16.msra.mxu0 %v247_v12 }
  0x25   :  { %170 = vmatprep.subr.bf16.mxu0 %v301_v0 }
  0x28   :  { %171 = vmatpush1.bf16.msra.mxu0 %v248_v13 }
  0x29   :  { %172 = vmatprep.subr.bf16.mxu0 %v301_v0 }
  0x2c   :  { %173 = vmatpush1.bf16.msra.mxu0 %v249_v14 }
  0x2d   :  { %182 = vmatprep.subr.bf16.mxu0 %v301_v0 }
  0x30   :  { %183 = vmatpush2.bf16.msra.mxu0 %v250_v15 }
  0x31   :  { %184 = vmatprep.subr.bf16.mxu0 %v301_v0 }
  0x34   :  { %185 = vmatpush2.bf16.msra.mxu0 %v251_v16 }
  0x35   :  { %186 = vmatprep.subr.bf16.mxu0 %v301_v0 }
  0x38   :  { %187 = vmatpush2.bf16.msra.mxu0 %v252_v17 }
  0x39   :  { %188 = vmatprep.subr.bf16.mxu0 %v301_v0 }
  0x3c   :  { %189 = vmatpush2.bf16.msra.mxu0 %v253_v18 }
  0x8e   :  { %v41_v21 = vpop.permute.xlu0 %40 }
  0x8f   :  { %vm45_vm4 = vcmp.eq.s32.totalorder %v41_v21, %v38_v20 }
  0x90   :  { %v218_v24 = vsel %vm45_vm4, 1.0, %v302_v23 }
  0x92   :  { %v44_v22 = vpop.permute.xlu0 %43 }
  0x93   :  { %vm46_vm5 = vcmp.eq.s32.totalorder %v44_v22, %v38_v20 }
  0x94   :  { %v219_v25 = vsel %vm46_vm5, 1.0, %v302_v23 }
  0x95   :  { %v51_v26 = vpack.c.bf16 %v219_v25, %v218_v24 }
  0x97   :  { %53 = vrot.lane.b32.xlu1 %v51_v26, %s299_s12  ;;  %232 = vmatprep.mubr.msk.bf16.mxu0 %vm55_vm6, %v51_v26 }
 0x109   :  { %v54_v27 = vpop.permute.xlu1 %53 }
 0x10a   :  { %v58_v28 = vsel %vm55_vm6, %v51_v26, %v54_v27 }
 0x10b   :  { %191 = vmatmul.mubr.bf16.vlgmr.msra.gmra.mxu0 %v58_v28 }
 0x1cb   :  { %v192_v29 = vpop.f32.mrf.mxu0 }
 0x1cc   :  { %199 = vst [vmem:[#allocation5] sm:$0xff] %v192_v29 }
 0x1cd   :  { %v194_v30 = vpop.f32.mrf.mxu0 }
 0x1cf   :  { %v195_v31 = vpop.f32.mrf.mxu0 }
 0x1d0   :  { %200 = vst [vmem:[#allocation5 + $0x8] sm:$0xff] %v195_v31 }
 0x1d1   :  { %v197_v32 = vpop.f32.mrf.mxu0 }
 0x1d2   :  { %285 = shalt.err (!%p282_p9)
}
 0x1d3   :  { %s304_s21 = smov 128   ;;  %s305_s22 = smov 8  }
 0x1d4   :  { %212 = dma.vmem_to_hbm [thread:$0]  %s207_s1, 256, %s338_s2, [#allocation4], %s304_s21, %s304_s21, %s305_s22  }
 0x1d5   :  { %296 = dma.done.wait [#allocation4], 256  }
 0x1d6   :  { %297 = vsyncadd [#allocation4], 4294967040 }
 0x1d7   :  { %216 = vsyncpa [#allocation3], 1 }
 0x1d8   :  { %217 = vsyncpa [#allocation4], 1 }

</bundles_post_ra>
